<compile_context>
chip_gen: v6e
topology: v6e:2x2x1
jax: 0.10.0
libtpu: 0.0.40
codegen_flags: <defaults>
</compile_context>

<pallas_src>
import functools

import jax
import jax.numpy as jnp
from jax.experimental import pallas as pl
from jax.experimental.pallas import tpu as pltpu


LANE = 128      # vreg lane width (last dim)
SUBLANE = 8     # fp32 sublane width (second-to-last dim)


# ----------------------------------------------------------------------------
# Small helpers
# ----------------------------------------------------------------------------
def _round_up(x, m):
    return (x + m - 1) // m * m


def _pad2(a, rows, cols):
    r, c = a.shape
    if r == rows and c == cols:
        return a
    return jnp.pad(a, ((0, rows - r), (0, cols - c)))


def _apply_act(y, act):
    # y is fp32 here (accumulator dtype) -> activation math stays in fp32,
    # which is also what v5e (no bf16 VPU/EUP) wants.
    if act is None:
        return y
    if act == "tanh":
        return jnp.tanh(y)
    if act == "relu":
        return jnp.maximum(y, 0.0)
    if act == "leaky_relu":
        return jnp.where(y >= 0.0, y, 0.01 * y)
    if act == "sigmoid":
        return jax.nn.sigmoid(y)
    raise ValueError(f"unknown activation: {act}")


# ----------------------------------------------------------------------------
# Fused whole-MLP kernel (all layers in one pallas_call, VMEM-resident)
# ----------------------------------------------------------------------------
def _fused_mlp_kernel(*refs, n_layers, acts):
    x_ref = refs[0]
    w_refs = refs[1:1 + 2 * n_layers:2]
    b_refs = refs[2:2 + 2 * n_layers:2]
    o_ref = refs[1 + 2 * n_layers]

    h = x_ref[...].astype(jnp.float32)
    # Static (unrolled) layer loop: MXU matmuls back-to-back, intermediates
    # live entirely in vregs/VMEM; EUP handles tanh/sigmoid in its own slot.
    for i in range(n_layers):
        y = jnp.dot(h.astype(w_refs[i].dtype), w_refs[i][...],
                    preferred_element_type=jnp.float32)
        y = y + b_refs[i][...].astype(jnp.float32)
        y = _apply_act(y, acts[i])
        h = y
    o_ref[...] = h.astype(o_ref.dtype)


@functools.partial(jax.jit, static_argnames=("acts", "tm_max", "compute_dtype"))
def fused_mlp_forward(x, params, *, acts, tm_max=512, compute_dtype=None):
    """Fused y = actL(...act1(act0(x @ W0 + b0) @ W1 + b1)...) in one call.

    params: list of (W (d_in, d_out), b (1, d_out)); acts: per-layer act name.
    """
    B, Din = x.shape
    n_layers = len(params)
    assert len(acts) == n_layers

    # Feature dims padded to lane width (128) -> lane-dense, unmasked stores.
    dims = [Din] + [w.shape[1] for (w, _) in params]
    dims_p = [_round_up(d, LANE) for d in dims]

    tm = min(_round_up(B, SUBLANE), tm_max)
    Bp = _round_up(B, tm)

    x_p = _pad2(x, Bp, dims_p[0])
    if compute_dtype is not None:
        x_p = x_p.astype(compute_dtype)
    flat_inputs = [x_p]
    in_specs = [pl.BlockSpec((tm, dims_p[0]), lambda i: (i, 0))]

    flops = 0
    transcendentals = 0
    bytes_accessed = x_p.size * x_p.dtype.itemsize
    for li, ((w, b), act) in enumerate(zip(params, acts)):
        din_p, dout_p = dims_p[li], dims_p[li + 1]
        w_p = _pad2(w, din_p, dout_p)
        b_p = _pad2(b, 1, dout_p)
        if compute_dtype is not None:
            w_p = w_p.astype(compute_dtype)
        flat_inputs += [w_p, b_p]
        in_specs += [
            pl.BlockSpec((din_p, dout_p), lambda i: (0, 0)),  # weights resident
            pl.BlockSpec((1, dout_p), lambda i: (0, 0)),      # bias resident
        ]
        flops += 2 * Bp * din_p * dout_p
        if act in ("tanh", "sigmoid"):
            transcendentals += Bp * dout_p
        bytes_accessed += (w_p.size * w_p.dtype.itemsize
                           + b_p.size * b_p.dtype.itemsize)

    dout_last_p = dims_p[-1]
    bytes_accessed += Bp * dout_last_p * jnp.dtype(x.dtype).itemsize

    # Explicit VMEM budget (inputs/outputs double-buffered by the pipeline),
    # capped at 64 MiB so the same config is safe on v7x.
    vmem_need = 2 * sum(a.size * a.dtype.itemsize for a in flat_inputs[1:])
    vmem_need += 2 * (tm * dims_p[0] + tm * dout_last_p) * 4
    vmem_need += 4 * tm * max(dims_p) * 4  # intermediates / headroom
    vmem_limit = int(min(max(vmem_need + (1 << 20), 16 << 20), 64 << 20))

    kernel = functools.partial(
        _fused_mlp_kernel, n_layers=n_layers, acts=tuple(acts))

    y_p = pl.pallas_call(
        kernel,
        out_shape=jax.ShapeDtypeStruct((Bp, dout_last_p), x.dtype),
        grid=(Bp // tm,),
        in_specs=in_specs,
        out_specs=pl.BlockSpec((tm, dout_last_p), lambda i: (i, 0)),
        compiler_params=pltpu.CompilerParams(
            dimension_semantics=("parallel",),   # batch axis -> 2 TCs on v7x
            vmem_limit_bytes=vmem_limit,
        ),
        cost_estimate=pl.CostEstimate(
            flops=flops,
            transcendentals=transcendentals,
            bytes_accessed=bytes_accessed,
        ),
    )(*flat_inputs)

    return y_p[:B, :dims[-1]]


# ----------------------------------------------------------------------------
# Tiled, pipelined single-layer kernel (fallback for large layers)
# ----------------------------------------------------------------------------
def _linear_tiled_kernel(x_ref, w_ref, b_ref, o_ref, acc_ref, *, act):
    k = pl.program_id(2)

    @pl.when(k == 0)
    def _():
        acc_ref[...] = jnp.zeros_like(acc_ref)

    acc_ref[...] += jnp.dot(x_ref[...], w_ref[...],
                            preferred_element_type=jnp.float32)

    @pl.when(k == pl.num_programs(2) - 1)
    def _():
        y = acc_ref[...] + b_ref[...].astype(jnp.float32)
        y = _apply_act(y, act)
        o_ref[...] = y.astype(o_ref.dtype)


@functools.partial(
    jax.jit, static_argnames=("act", "tm", "tn", "tk", "compute_dtype"))
def pallas_linear_tiled(x, w, b, *, act=None, tm=256, tn=256, tk=512,
                        compute_dtype=None):
    """y = act(x @ w + b) with (tm, tn, tk) tiling and an fp32 accumulator."""
    B, Din = x.shape
    Din_w, Dout = w.shape
    assert Din == Din_w
    if b.ndim == 1:
        b = b.reshape(1, -1)

    # Pad K / N only to the lane width, then snap the tile to a divisor of
    # that padded extent so no reduction / output work is wasted on padding.
    Din_p = _round_up(Din, LANE)
    tk = min(_round_up(tk, LANE), Din_p)
    if Din_p % tk != 0:
        tk = LANE
    Dout_p = _round_up(Dout, LANE)
    tn = min(_round_up(tn, LANE), Dout_p)
    if Dout_p % tn != 0:
        tn = LANE
    tm = min(_round_up(B, SUBLANE), _round_up(tm, SUBLANE))
    Bp = _round_up(B, tm)

    x_p = _pad2(x, Bp, Din_p)
    w_p = _pad2(w, Din_p, Dout_p)
    b_p = _pad2(b, 1, Dout_p)
    if compute_dtype is not None:
        x_p = x_p.astype(compute_dtype)
        w_p = w_p.astype(compute_dtype)

    grid = (Bp // tm, Dout_p // tn, Din_p // tk)
    transcendentals = Bp * Dout_p if act in ("tanh", "sigmoid") else 0
    cost = pl.CostEstimate(
        flops=2 * Bp * Din_p * Dout_p,
        transcendentals=transcendentals,
        bytes_accessed=(x_p.size * x_p.dtype.itemsize
                        + w_p.size * w_p.dtype.itemsize
                        + b_p.size * b_p.dtype.itemsize
                        + Bp * Dout_p * jnp.dtype(x.dtype).itemsize),
    )

    y_p = pl.pallas_call(
        functools.partial(_linear_tiled_kernel, act=act),
        out_shape=jax.ShapeDtypeStruct((Bp, Dout_p), x.dtype),
        grid=grid,
        in_specs=[
            pl.BlockSpec((tm, tk), lambda i, j, k: (i, k)),
            pl.BlockSpec((tk, tn), lambda i, j, k: (k, j)),
            pl.BlockSpec((1, tn), lambda i, j, k: (0, j)),
        ],
        out_specs=pl.BlockSpec((tm, tn), lambda i, j, k: (i, j)),
        scratch_shapes=[pltpu.VMEM((tm, tn), jnp.float32)],
        compiler_params=pltpu.CompilerParams(
            dimension_semantics=("parallel", "parallel", "arbitrary"),
            vmem_limit_bytes=48 * 1024 * 1024,   # tiles sized well below this
        ),
        cost_estimate=cost,
    )(x_p, w_p, b_p)

    return y_p[:B, :Dout]


# ----------------------------------------------------------------------------
# FC module (parameter construction + forward orchestration)
# ----------------------------------------------------------------------------
def _xavier_uniform(key, fan_in, fan_out):
    limit = jnp.sqrt(6.0 / (fan_in + fan_out))
    return jax.random.uniform(
        key, (fan_in, fan_out), jnp.float32, minval=-limit, maxval=limit)


def _xavier_normal(key, fan_in, fan_out):
    std = jnp.sqrt(2.0 / (fan_in + fan_out))
    return std * jax.random.normal(key, (fan_in, fan_out), jnp.float32)


def _kaiming_normal(key, fan_in, fan_out):
    # kaiming_normal_ with nonlinearity 'relu' / 'leaky_relu' (a=0): gain sqrt(2)
    std = jnp.sqrt(2.0 / fan_in)
    return std * jax.random.normal(key, (fan_in, fan_out), jnp.float32)


class FCPallas:
    """JAX/Pallas equivalent of the PyTorch FC module.

    dims_list semantics match the reference:
      neurons = dims_list[:-1] define the hidden Linear layers,
      lastLayer = Linear(neurons[-1], dims_list[-1]).
    Weights are stored transposed: (in, out).
    """

    def __init__(self, dims_list, act=None, output_act=None, key=None,
                 force_tiled=False, compute_dtype=None):
        if key is None:
            key = jax.random.PRNGKey(0)
        self.act = act                # None/"tanh"/"relu"/"leaky_relu"/"sigmoid"
        self.output_act = output_act
        self.force_tiled = force_tiled
        self.compute_dtype = compute_dtype

        neurons = dims_list[:-1]
        self.hidden_params = []
        for i in range(1, len(neurons)):
            key, sub = jax.random.split(key)
            fan_in, fan_out = neurons[i - 1], neurons[i]
            w = self._init_w(sub, fan_in, fan_out, act)
            b = jnp.zeros((1, fan_out), jnp.float32)
            self.hidden_params.append((w, b))

        key, sub = jax.random.split(key)
        fan_in, fan_out = neurons[-1], dims_list[-1]
        w_last = self._init_w(sub, fan_in, fan_out, output_act)
        b_last = jnp.zeros((1, fan_out), jnp.float32)
        self.last_params = (w_last, b_last)

    @staticmethod
    def _init_w(key, fan_in, fan_out, act_func):
        if act_func == "tanh":
            return _xavier_uniform(key, fan_in, fan_out)
        elif act_func in ("relu", "leaky_relu"):
            return _kaiming_normal(key, fan_in, fan_out)
        else:
            return _xavier_normal(key, fan_in, fan_out)

    @staticmethod
    def _fits_fused(batch, params):
        dims = [params[0][0].shape[0]] + [w.shape[1] for w, _ in params]
        dims_p = [_round_up(d, LANE) for d in dims]
        tm = min(_round_up(batch, SUBLANE), 512)
        weight_bytes = sum((dims_p[i] * dims_p[i + 1] + dims_p[i + 1]) * 4
                           for i in range(len(params)))
        act_bytes = tm * max(dims_p) * 4
        need = 2 * weight_bytes + 6 * act_bytes   # double-buffer + headroom
        return need <= 24 * 1024 * 1024           # conservative for v7x 64 MiB

    def __call__(self, x):
        params = self.hidden_params + [self.last_params]
        acts = tuple([self.act] * len(self.hidden_params) + [self.output_act])
        if not self.force_tiled and self._fits_fused(x.shape[0], params):
            return fused_mlp_forward(
                x, params, acts=acts, compute_dtype=self.compute_dtype)
        # Fallback: layer-by-layer, tiled + pipelined.
        for (w, b), a in zip(params, acts):
            x = pallas_linear_tiled(x, w, b, act=a,
                                    compute_dtype=self.compute_dtype)
        return x


# ----------------------------------------------------------------------------
if __name__ == "__main__":
    key = jax.random.PRNGKey(0)
    key, xkey = jax.random.split(key)

    # Small shapes: batch=8, two hidden Linear layers + last layer.
    dims_list = [32, 64, 48, 16]
    batch = 8
    x = jax.random.normal(xkey, (batch, dims_list[0]), jnp.float32)

    model = FCPallas(dims_list, act="tanh", output_act=None, key=key)
    y = jax.block_until_ready(model(x))

    # Pure-JAX reference of the same math / params (fused-path check).
    ref = x
    for w, b in model.hidden_params:
        ref = jnp.tanh(ref @ w + b)
    w, b = model.last_params
    ref = ref @ w + b

    assert y.shape == (batch, dims_list[-1]), y.shape
    assert jnp.allclose(y, ref, atol=1e-5, rtol=1e-5), \
        float(jnp.max(jnp.abs(y - ref)))

    # Also exercise the tiled fallback path on a non-aligned moderate shape.
    key, k1, k2, k3 = jax.random.split(key, 4)
    B2, Din2, Dout2 = 200, 320, 200
    x2 = jax.random.normal(k1, (B2, Din2), jnp.float32)
    w2 = 0.05 * jax.random.normal(k2, (Din2, Dout2), jnp.float32)
    b2 = jax.random.normal(k3, (1, Dout2), jnp.float32)
    y2 = jax.block_until_ready(pallas_linear_tiled(x2, w2, b2, act="relu"))
    ref2 = jnp.maximum(x2 @ w2 + b2, 0.0)
    assert y2.shape == (B2, Dout2), y2.shape
    assert jnp.allclose(y2, ref2, atol=1e-3, rtol=1e-3), \
        float(jnp.max(jnp.abs(y2 - ref2)))

    print("KERNEL_OK")
</pallas_src>

<mosaic_0001>
module attributes {stable_mosaic.version = 11 : i64} {
  func.func @_fused_mlp_kernel(%arg0: i32, %arg1: memref<8x128xf32, #tpu.memory_space<vmem>>, %arg2: memref<128x128xf32, #tpu.memory_space<vmem>>, %arg3: memref<1x128xf32, #tpu.memory_space<vmem>>, %arg4: memref<128x128xf32, #tpu.memory_space<vmem>>, %arg5: memref<1x128xf32, #tpu.memory_space<vmem>>, %arg6: memref<128x128xf32, #tpu.memory_space<vmem>>, %arg7: memref<1x128xf32, #tpu.memory_space<vmem>>, %arg8: memref<8x128xf32, #tpu.memory_space<vmem>>) attributes {dimension_semantics = [#tpu.dimension_semantics<parallel>], iteration_bounds = array<i64: 1>, scalar_prefetch = 0 : i64, scratch_operands = 0 : i64, tpu.core_type = #tpu.core_type<tc>, window_params = [{transform_indices = @transform_0, window_bounds = array<i64: 8, 128>}, {pipeline_mode = #tpu.pipeline_mode<synchronous>, transform_indices = @transform_1, window_bounds = array<i64: 128, 128>}, {pipeline_mode = #tpu.pipeline_mode<synchronous>, transform_indices = @transform_2, window_bounds = array<i64: 1, 128>}, {pipeline_mode = #tpu.pipeline_mode<synchronous>, transform_indices = @transform_3, window_bounds = array<i64: 128, 128>}, {pipeline_mode = #tpu.pipeline_mode<synchronous>, transform_indices = @transform_4, window_bounds = array<i64: 1, 128>}, {pipeline_mode = #tpu.pipeline_mode<synchronous>, transform_indices = @transform_5, window_bounds = array<i64: 128, 128>}, {pipeline_mode = #tpu.pipeline_mode<synchronous>, transform_indices = @transform_6, window_bounds = array<i64: 1, 128>}, {transform_indices = @transform_7, window_bounds = array<i64: 8, 128>}]} {
    %c0 = arith.constant 0 : index
    %c0_0 = arith.constant 0 : index
    %0 = vector.load %arg1[%c0, %c0_0] : memref<8x128xf32, #tpu.memory_space<vmem>>, vector<8x128xf32>
    %c0_1 = arith.constant 0 : index
    %c0_2 = arith.constant 0 : index
    %1 = vector.load %arg2[%c0_1, %c0_2] : memref<128x128xf32, #tpu.memory_space<vmem>>, vector<128x128xf32>
    %cst = arith.constant dense<0.000000e+00> : vector<8x128xf32>
    %2 = tpu.matmul %0, %1, %cst {dimension_numbers = #tpu.dot_dimension_numbers<[1], [0], [0], [1], [0, 0, 1, 1], [], []>} : vector<8x128xf32>, vector<128x128xf32>, vector<8x128xf32> -> vector<8x128xf32>
    %c0_3 = arith.constant 0 : index
    %c0_4 = arith.constant 0 : index
    %3 = vector.load %arg3[%c0_3, %c0_4] : memref<1x128xf32, #tpu.memory_space<vmem>>, vector<1x128xf32>
    %4 = vector.broadcast %3 : vector<1x128xf32> to vector<8x128xf32>
    %5 = arith.addf %2, %4 : vector<8x128xf32>
    %6 = math.tanh %5 : vector<8x128xf32>
    %c0_5 = arith.constant 0 : index
    %c0_6 = arith.constant 0 : index
    %7 = vector.load %arg4[%c0_5, %c0_6] : memref<128x128xf32, #tpu.memory_space<vmem>>, vector<128x128xf32>
    %cst_7 = arith.constant dense<0.000000e+00> : vector<8x128xf32>
    %8 = tpu.matmul %6, %7, %cst_7 {dimension_numbers = #tpu.dot_dimension_numbers<[1], [0], [0], [1], [0, 0, 1, 1], [], []>} : vector<8x128xf32>, vector<128x128xf32>, vector<8x128xf32> -> vector<8x128xf32>
    %c0_8 = arith.constant 0 : index
    %c0_9 = arith.constant 0 : index
    %9 = vector.load %arg5[%c0_8, %c0_9] : memref<1x128xf32, #tpu.memory_space<vmem>>, vector<1x128xf32>
    %10 = vector.broadcast %9 : vector<1x128xf32> to vector<8x128xf32>
    %11 = arith.addf %8, %10 : vector<8x128xf32>
    %12 = math.tanh %11 : vector<8x128xf32>
    %c0_10 = arith.constant 0 : index
    %c0_11 = arith.constant 0 : index
    %13 = vector.load %arg6[%c0_10, %c0_11] : memref<128x128xf32, #tpu.memory_space<vmem>>, vector<128x128xf32>
    %cst_12 = arith.constant dense<0.000000e+00> : vector<8x128xf32>
    %14 = tpu.matmul %12, %13, %cst_12 {dimension_numbers = #tpu.dot_dimension_numbers<[1], [0], [0], [1], [0, 0, 1, 1], [], []>} : vector<8x128xf32>, vector<128x128xf32>, vector<8x128xf32> -> vector<8x128xf32>
    %c0_13 = arith.constant 0 : index
    %c0_14 = arith.constant 0 : index
    %15 = vector.load %arg7[%c0_13, %c0_14] : memref<1x128xf32, #tpu.memory_space<vmem>>, vector<1x128xf32>
    %16 = vector.broadcast %15 : vector<1x128xf32> to vector<8x128xf32>
    %17 = arith.addf %14, %16 : vector<8x128xf32>
    %c0_15 = arith.constant 0 : index
    %c0_16 = arith.constant 0 : index
    %18 = vector.load %arg8[%c0_15, %c0_16] : memref<8x128xf32, #tpu.memory_space<vmem>>, vector<8x128xf32>
    tpu.vector_store %arg8[%c0_15, %c0_16], %17 {strides = array<i32>} : memref<8x128xf32, #tpu.memory_space<vmem>>, vector<8x128xf32>,
    return
  }
  func.func @transform_0(%arg0: i32) -> (i32, i32) {
    %c0_i32 = arith.constant 0 : i32
    %c0_i32_0 = arith.constant 0 : i32
    return %arg0, %c0_i32 : i32, i32
  }
  func.func @transform_1(%arg0: i32) -> (i32, i32) {
    %c0_i32 = arith.constant 0 : i32
    %c0_i32_0 = arith.constant 0 : i32
    %c0_i32_1 = arith.constant 0 : i32
    return %c0_i32, %c0_i32_0 : i32, i32
  }
  func.func @transform_2(%arg0: i32) -> (i32, i32) {
    %c0_i32 = arith.constant 0 : i32
    %c0_i32_0 = arith.constant 0 : i32
    %c0_i32_1 = arith.constant 0 : i32
    return %c0_i32, %c0_i32_0 : i32, i32
  }
  func.func @transform_3(%arg0: i32) -> (i32, i32) {
    %c0_i32 = arith.constant 0 : i32
    %c0_i32_0 = arith.constant 0 : i32
    %c0_i32_1 = arith.constant 0 : i32
    return %c0_i32, %c0_i32_0 : i32, i32
  }
  func.func @transform_4(%arg0: i32) -> (i32, i32) {
    %c0_i32 = arith.constant 0 : i32
    %c0_i32_0 = arith.constant 0 : i32
    %c0_i32_1 = arith.constant 0 : i32
    return %c0_i32, %c0_i32_0 : i32, i32
  }
  func.func @transform_5(%arg0: i32) -> (i32, i32) {
    %c0_i32 = arith.constant 0 : i32
    %c0_i32_0 = arith.constant 0 : i32
    %c0_i32_1 = arith.constant 0 : i32
    return %c0_i32, %c0_i32_0 : i32, i32
  }
  func.func @transform_6(%arg0: i32) -> (i32, i32) {
    %c0_i32 = arith.constant 0 : i32
    %c0_i32_0 = arith.constant 0 : i32
    %c0_i32_1 = arith.constant 0 : i32
    return %c0_i32, %c0_i32_0 : i32, i32
  }
  func.func @transform_7(%arg0: i32) -> (i32, i32) {
    %c0_i32 = arith.constant 0 : i32
    %c0_i32_0 = arith.constant 0 : i32
    return %arg0, %c0_i32 : i32, i32
  }
}

</mosaic_0001>

<bundles_post_ra>
// kernel: fused_mlp_forward.1
= control target key start
LH: loop header
LB: loop body
LE: loop exit
PB: predicated region body
PF: predicated region fallthrough
CT: control target
= control target key end

     0   :  { %v512_v1 = vmov 0.0   ;;  %vm513_vm0 = vmmov 0   ;;  %s768_s0 = inlined_call_operand.vmem [shape: f32[8,128], index: 0, kind: input, shape index: {}]   ;;  %s769_s1 = inlined_call_operand.vmem [shape: f32[128,128], index: 1, kind: input, shape index: {}]   ;;  %s770_s2 = inlined_call_operand.vmem [shape: f32[1,128], index: 2, kind: input, shape index: {}]   ;;  %s771_s3 = inlined_call_operand.vmem [shape: f32[128,128], index: 3, kind: input, shape index: {}]   ;;  %s772_s4 = inlined_call_operand.vmem [shape: f32[1,128], index: 4, kind: input, shape index: {}]   ;;  %s773_s5 = inlined_call_operand.vmem [shape: f32[128,128], index: 5, kind: input, shape index: {}]   ;;  %s774_s6 = inlined_call_operand.vmem [shape: f32[1,128], index: 6, kind: input, shape index: {}]   ;;  %s775_s7 = inlined_call_operand.hbm [shape: f32[8,128], index: 7, kind: output, shape index: {}]  }
   0x1   :  { %v43_v0 = vld [vmem:[%s769_s1 + $0x78] sm:$0xff]  ;;  %378 = vmatprep.subr.mxu0 %v512_v1  ;;  %v42_v2 = vld [vmem:[%s769_s1 + $0x70] sm:$0xff]  ;;  %410 = vmatprep.mubr.msk.f32.mxu0 %vm513_vm0, %v512_v1  ;;  %v41_v3 = vld [vmem:[%s769_s1 + $0x68] sm:$0xff] }
   0x2   :  { %379 = vmatpush3.msra.mxu0 %v43_v0  ;;  %413 = vmatprep.subr.mxu1 %v512_v1  ;;  %v40_v4 = vld [vmem:[%s769_s1 + $0x60] sm:$0xff]  ;;  %v137_v5 = vld [vmem:[%s771_s3 + $0x78] sm:$0xff]  ;;  %v136_v6 = vld [vmem:[%s771_s3 + $0x70] sm:$0xff] }
   0x3   :  { %380 = vmatprep.subr.mxu0 %v512_v1  ;;  %445 = vmatprep.mubr.msk.f32.mxu1 %vm513_vm0, %v512_v1  ;;  %v39_v7 = vld [vmem:[%s769_s1 + $0x58] sm:$0xff]  ;;  %v135_v8 = vld [vmem:[%s771_s3 + $0x68] sm:$0xff] }
   0x4   :  { %381 = vmatpush3.msra.mxu0 %v42_v2  ;;  %414 = vmatpush3.msra.mxu1 %v137_v5 }
   0x5   :  { %382 = vmatprep.subr.mxu0 %v512_v1  ;;  %415 = vmatprep.subr.mxu1 %v512_v1 }
   0x6   :  { %383 = vmatpush3.msra.mxu0 %v41_v3  ;;  %416 = vmatpush3.msra.mxu1 %v136_v6 }
   0x7   :  { %384 = vmatprep.subr.mxu0 %v512_v1 }
   0x8   :  { %385 = vmatpush3.msra.mxu0 %v40_v4 }
   0x9   :  { %12 = vsyncpa [#allocation3], 0  ;;  %386 = vmatprep.subr.mxu0 %v512_v1  ;;  %v38_v9 = vld [vmem:[%s769_s1 + $0x50] sm:$0xff]  ;;  %417 = vmatprep.subr.mxu1 %v512_v1  ;;  %v134_v10 = vld [vmem:[%s771_s3 + $0x60] sm:$0xff]  ;;  %s514_s28 = smov [#allocation2]  }
   0xa   :  { %387 = vmatpush3.msra.mxu0 %v39_v7  ;;  %418 = vmatpush3.msra.mxu1 %v135_v8  ;;  %v37_v11 = vld [vmem:[%s769_s1 + $0x48] sm:$0xff]  ;;  %v133_v12 = vld [vmem:[%s771_s3 + $0x58] sm:$0xff]  ;;  %v36_v13 = vld [vmem:[%s769_s1 + $0x40] sm:$0xff] }
   0xb   :  { %388 = vmatprep.subr.mxu0 %v512_v1  ;;  %419 = vmatprep.subr.mxu1 %v512_v1  ;;  %v132_v14 = vld [vmem:[%s771_s3 + $0x50] sm:$0xff]  ;;  %v35_v15 = vld [vmem:[%s769_s1 + $0x38] sm:$0xff]  ;;  %v131_v16 = vld [vmem:[%s771_s3 + $0x48] sm:$0xff] }
   0xc   :  { %389 = vmatpush3.msra.mxu0 %v38_v9  ;;  %420 = vmatpush3.msra.mxu1 %v134_v10  ;;  %v34_v17 = vld [vmem:[%s769_s1 + $0x30] sm:$0xff]  ;;  %v33_v18 = vld [vmem:[%s769_s1 + $0x28] sm:$0xff]  ;;  %v32_v19 = vld [vmem:[%s769_s1 + $0x20] sm:$0xff] }
   0xd   :  { %390 = vmatprep.subr.mxu0 %v512_v1  ;;  %421 = vmatprep.subr.mxu1 %v512_v1  ;;  %v31_v20 = vld [vmem:[%s769_s1 + $0x18] sm:$0xff]  ;;  %v30_v21 = vld [vmem:[%s769_s1 + $0x10] sm:$0xff]  ;;  %v29_v22 = vld [vmem:[%s769_s1 + $0x8] sm:$0xff] }
   0xe   :  { %391 = vmatpush3.msra.mxu0 %v37_v11  ;;  %422 = vmatpush3.msra.mxu1 %v133_v12  ;;  %v28_v23 = vld [vmem:[%s769_s1] sm:$0xff]  ;;  %v129_v26 = vld [vmem:[%s771_s3 + $0x38] sm:$0xff]  ;;  %v128_v27 = vld [vmem:[%s771_s3 + $0x30] sm:$0xff] }
   0xf   :  { %392 = vmatprep.subr.mxu0 %v512_v1  ;;  %423 = vmatprep.subr.mxu1 %v512_v1  ;;  %v27_v24 = vld [vmem:[%s768_s0] sm:$0xff]  ;;  %v127_v28 = vld [vmem:[%s771_s3 + $0x28] sm:$0xff]  ;;  %v125_v30 = vld [vmem:[%s771_s3 + $0x18] sm:$0xff] }
  0x10   :  { %393 = vmatpush3.msra.mxu0 %v36_v13  ;;  %424 = vmatpush3.msra.mxu1 %v132_v14  ;;  %v130_v25 = vld [vmem:[%s771_s3 + $0x40] sm:$0xff]  ;;  %v124_v31 = vld [vmem:[%s771_s3 + $0x10] sm:$0xff]  ;;  %v123_v32 = vld [vmem:[%s771_s3 + $0x8] sm:$0xff] }
  0x11   :  { %394 = vmatprep.subr.mxu0 %v512_v1  ;;  %425 = vmatprep.subr.mxu1 %v512_v1  ;;  %v126_v29 = vld [vmem:[%s771_s3 + $0x20] sm:$0xff]  ;;  %v231_v34 = vld [vmem:[%s773_s5 + $0x78] sm:$0xff]  ;;  %v230_v35 = vld [vmem:[%s773_s5 + $0x70] sm:$0xff] }
  0x12   :  { %395 = vmatpush3.msra.mxu0 %v35_v15  ;;  %426 = vmatpush3.msra.mxu1 %v131_v16  ;;  %v122_v33 = vld [vmem:[%s771_s3] sm:$0xff]  ;;  %v229_v36 = vld [vmem:[%s773_s5 + $0x68] sm:$0xff]  ;;  %v227_v38 = vld [vmem:[%s773_s5 + $0x58] sm:$0xff] }
  0x13   :  { %396 = vmatprep.subr.mxu0 %v512_v1  ;;  %427 = vmatprep.subr.mxu1 %v512_v1  ;;  %v228_v37 = vld [vmem:[%s773_s5 + $0x60] sm:$0xff]  ;;  %v226_v39 = vld [vmem:[%s773_s5 + $0x50] sm:$0xff]  ;;  %v225_v40 = vld [vmem:[%s773_s5 + $0x48] sm:$0xff] }
  0x14   :  { %397 = vmatpush3.msra.mxu0 %v34_v17  ;;  %428 = vmatpush3.msra.mxu1 %v130_v25  ;;  %v324_v41 = vld [vmem:[%s770_s2] ss:$0 sm:$0xff]  ;;  %v223_v47 = vld [vmem:[%s773_s5 + $0x38] sm:$0xff]  ;;  %v222_v48 = vld [vmem:[%s773_s5 + $0x30] sm:$0xff] }
  0x15   :  { %398 = vmatprep.subr.mxu0 %v512_v1  ;;  %429 = vmatprep.subr.mxu1 %v512_v1  ;;  %v224_v46 = vld [vmem:[%s773_s5 + $0x40] sm:$0xff]  ;;  %v221_v49 = vld [vmem:[%s773_s5 + $0x28] sm:$0xff]  ;;  %v219_v51 = vld [vmem:[%s773_s5 + $0x18] sm:$0xff] }
  0x16   :  { %399 = vmatpush3.msra.mxu0 %v33_v18  ;;  %430 = vmatpush3.msra.mxu1 %v129_v26  ;;  %v220_v50 = vld [vmem:[%s773_s5 + $0x20] sm:$0xff]  ;;  %v218_v52 = vld [vmem:[%s773_s5 + $0x10] sm:$0xff]  ;;  %v217_v53 = vld [vmem:[%s773_s5 + $0x8] sm:$0xff] }
  0x17   :  { %400 = vmatprep.subr.mxu0 %v512_v1  ;;  %431 = vmatprep.subr.mxu1 %v512_v1  ;;  %v216_v54 = vld [vmem:[%s773_s5] sm:$0xff]  ;;  %s316_s5 = sshll.u32 %s514_s28, 4  ;;  %s317_s5 = int_to_ptr.vmem [resolvable:$true] %s316_s5 }
  0x18   :  { %401 = vmatpush3.msra.mxu0 %v32_v19  ;;  %432 = vmatpush3.msra.mxu1 %v128_v27  ;;  %v325_v55 = vld [vmem:[%s772_s4] ss:$0 sm:$0xff]  ;;  %s490_s0 = scalar_lea.vmem %s317_s5, 128  ;;  %p495_p1 = scmp.lt.s32.totalorder %s317_s5, %s317_s5 }
  0x19   :  { %402 = vmatprep.subr.mxu0 %v512_v1  ;;  %433 = vmatprep.subr.mxu1 %v512_v1  ;;  %v326_v60 = vld [vmem:[%s774_s6] ss:$0 sm:$0xff]  ;;  %p491_p0 = scmp.ne.s32.totalorder %s317_s5, %s490_s0  ;;  %p496_p2 = scmp.lt.s32.totalorder %s490_s0, %s490_s0 }
  0x1a   :  { %403 = vmatpush3.msra.mxu0 %v31_v20  ;;  %434 = vmatpush3.msra.mxu1 %v127_v28 }
  0x1b   :  { %404 = vmatprep.subr.mxu0 %v512_v1  ;;  %435 = vmatprep.subr.mxu1 %v512_v1  ;;  %p497_p3 = por %p496_p2, %p495_p1 }
  0x1c   :  { %405 = vmatpush3.msra.mxu0 %v30_v21  ;;  %436 = vmatpush3.msra.mxu1 %v126_v29 }
  0x1d   :  { %406 = vmatprep.subr.mxu0 %v512_v1  ;;  %437 = vmatprep.subr.mxu1 %v512_v1  ;;  %p498_p4 = pnand %p497_p3, %p491_p0 }
  0x1e   :  { %407 = vmatpush3.msra.mxu0 %v29_v22  ;;  %438 = vmatpush3.msra.mxu1 %v125_v30 }
  0x1f   :  { %408 = vmatprep.subr.mxu0 %v512_v1  ;;  %439 = vmatprep.subr.mxu1 %v512_v1 }
  0x20   :  { %409 = vmatpush3.msra.mxu0 %v28_v23  ;;  %440 = vmatpush3.msra.mxu1 %v124_v31 }
  0x21   :  { %411 = vmatmul.mubr.f32.vlgmr.msra.gmra.mxu0 %v27_v24  ;;  %448 = vmatprep.subr.mxu0 %v512_v1 }
  0x22   :  { %480 = vmatprep.mubr.msk.f32.mxu0 %vm513_vm0, %v512_v1  ;;  %441 = vmatprep.subr.mxu1 %v512_v1 }
  0x23   :  { %442 = vmatpush3.msra.mxu1 %v123_v32  ;;  %449 = vmatpush3.msra.mxu0 %v231_v34 }
  0x24   :  { %443 = vmatprep.subr.mxu1 %v512_v1  ;;  %450 = vmatprep.subr.mxu0 %v512_v1 }
  0x25   :  { %444 = vmatpush3.msra.mxu1 %v122_v33  ;;  %451 = vmatpush3.msra.mxu0 %v230_v35 }
  0x26   :  { %452 = vmatprep.subr.mxu0 %v512_v1 }
  0x27   :  { %453 = vmatpush3.msra.mxu0 %v229_v36 }
  0x28   :  { %454 = vmatprep.subr.mxu0 %v512_v1 }
  0x29   :  { %455 = vmatpush3.msra.mxu0 %v228_v37 }
  0x2a   :  { %456 = vmatprep.subr.mxu0 %v512_v1 }
  0x2b   :  { %457 = vmatpush3.msra.mxu0 %v227_v38 }
  0x2c   :  { %458 = vmatprep.subr.mxu0 %v512_v1 }
  0x2d   :  { %459 = vmatpush3.msra.mxu0 %v226_v39 }
  0x2e   :  { %460 = vmatprep.subr.mxu0 %v512_v1 }
  0x2f   :  { %461 = vmatpush3.msra.mxu0 %v225_v40 }
  0x30   :  { %462 = vmatprep.subr.mxu0 %v512_v1 }
  0x31   :  { %463 = vmatpush3.msra.mxu0 %v224_v46 }
  0x32   :  { %464 = vmatprep.subr.mxu0 %v512_v1 }
  0x33   :  { %465 = vmatpush3.msra.mxu0 %v223_v47 }
  0x34   :  { %466 = vmatprep.subr.mxu0 %v512_v1 }
  0x35   :  { %467 = vmatpush3.msra.mxu0 %v222_v48 }
  0x36   :  { %468 = vmatprep.subr.mxu0 %v512_v1 }
  0x37   :  { %469 = vmatpush3.msra.mxu0 %v221_v49 }
  0x38   :  { %470 = vmatprep.subr.mxu0 %v512_v1 }
  0x39   :  { %471 = vmatpush3.msra.mxu0 %v220_v50 }
  0x3a   :  { %472 = vmatprep.subr.mxu0 %v512_v1 }
  0x3b   :  { %473 = vmatpush3.msra.mxu0 %v219_v51 }
  0x3c   :  { %474 = vmatprep.subr.mxu0 %v512_v1 }
  0x3d   :  { %475 = vmatpush3.msra.mxu0 %v218_v52 }
  0x3e   :  { %476 = vmatprep.subr.mxu0 %v512_v1 }
  0x3f   :  { %477 = vmatpush3.msra.mxu0 %v217_v53 }
  0x40   :  { %478 = vmatprep.subr.mxu0 %v512_v1 }
  0x41   :  { %479 = vmatpush3.msra.mxu0 %v216_v54 }
  0xe1   :  { %v117_v42 = vpop.f32.mrf.mxu0 }
  0xe2   :  { %v118_v43 = vadd.f32 %v324_v41, %v117_v42 }
  0xe3   :  { %v412_v44 = vpop.f32.mrf.mxu0 }
  0xe4   :  { %486 = vtanh.f32 %v118_v43 }
  0xf1   :  { %v487_v45 = vpop.eup %486 }
  0xf2   :  { %446 = vmatmul.mubr.f32.vlgmr.msra.gmra.mxu1 %v487_v45 }
 0x1b2   :  { %v211_v56 = vpop.f32.mrf.mxu1 }
 0x1b3   :  { %v212_v57 = vadd.f32 %v325_v55, %v211_v56 }
 0x1b4   :  { %v447_v58 = vpop.f32.mrf.mxu1 }
 0x1b5   :  { %488 = vtanh.f32 %v212_v57 }
 0x1c2   :  { %v489_v59 = vpop.eup %488 }
 0x1c3   :  { %481 = vmatmul.mubr.f32.vlgmr.msra.gmra.mxu0 %v489_v59 }
 0x283   :  { %v305_v61 = vpop.f32.mrf.mxu0 }
 0x284   :  { %v306_v62 = vadd.f32 %v326_v60, %v305_v61 }
 0x285   :  { %v482_v63 = vpop.f32.mrf.mxu0 }
 0x286   :  { %309 = vst [vmem:[#allocation2] sm:$0xff] %v306_v62 }
 0x287   :  { %501 = shalt.err (!%p498_p4)
}
 0x288   :  { %319 = dma.vmem_to_hbm [thread:$0]  %s317_s5, 128, %s775_s7, [#allocation3]  }
 0x289   :  { %510 = dma.done.wait [#allocation3], 128  }
 0x28a   :  { %511 = vsyncadd [#allocation3], 4294967168 }
 0x28b   :  { %323 = vsyncpa [#allocation3], 1 }

</bundles_post_ra>
